<compile_context>
chip_gen: v7x
topology: tpu7x:2x2x1
jax: 0.10.0
libtpu: 0.0.40
codegen_flags: <defaults>
</compile_context>

<pallas_src>
import functools
import math

import jax
import jax.numpy as jnp
import numpy as np
from jax.experimental import pallas as pl
from jax.experimental.pallas import tpu as pltpu

# Conservative VMEM planning constants (valid across v5e / v6e / v7x).
_VMEM_WORKSET_BUDGET = 20 * 1024 * 1024   # target working set for tiles
_VMEM_LIMIT_BYTES = 32 * 1024 * 1024      # scoped VMEM limit we request


def _round_up(n, m):
    return ((n + m - 1) // m) * m


def _is_tracer(v):
    try:
        return isinstance(v, jax.core.Tracer)
    except Exception:
        return False


# ---------------------------------------------------------------------------
# Kernels
# ---------------------------------------------------------------------------
def _fused_patch_proj_kernel(x_ref, w_ref, b_ref, o_ref, *,
                             gh, gw, ph, pw, compute_dtype):
    """One image per grid step: gather patches in VMEM, then project.

    x_ref: (1, C, gh*ph, gw*pw)  raw NCHW image tile (input dtype)
    w_ref: (K, Ep)               VMEM-resident projection weight
    b_ref: (1, Ep)               f32 bias
    o_ref: (1, gh*gw, Ep)        output tile
    """
    C = x_ref.shape[1]
    xb = x_ref[0]                                     # (C, gh*ph, gw*pw)
    # (C, gh, ph, gw, pw) -> (gh, gw, C, ph, pw) -> (num_patches, K).
    # Pure VMEM/XLU work, hidden under the HBM DMA of the next image.
    p = xb.reshape(C, gh, ph, gw, pw)
    p = jnp.transpose(p, (1, 3, 0, 2, 4))
    p = p.reshape(gh * gw, C * ph * pw)
    acc = jnp.dot(p.astype(compute_dtype), w_ref[...],
                  preferred_element_type=jnp.float32)
    o_ref[0] = (acc + b_ref[...]).astype(o_ref.dtype)


def _patch_proj_kernel(p_ref, w_ref, b_ref, o_ref):
    """Fallback: streamed (tm, Kp) @ (Kp, Ep) + bias, f32 accumulate."""
    acc = jnp.dot(p_ref[...], w_ref[...], preferred_element_type=jnp.float32)
    o_ref[...] = (acc + b_ref[...]).astype(o_ref.dtype)


# ---------------------------------------------------------------------------
# Fused-path plumbing
# ---------------------------------------------------------------------------
def _fused_vmem_bytes(C, Hc, Wc, K, Ep, n_patches, in_sz, csz, osz):
    x_blk = C * Hc * Wc * in_sz                      # one image tile
    gathered = n_patches * K * (in_sz + csz)         # reshuffle + cast temps
    weight = 2 * K * Ep * csz                        # double-buffered resident
    out_blk = n_patches * Ep * (4 + 2 * osz)         # f32 acc + out buffers
    return 2 * x_blk + 2 * gathered + weight + out_blk + Ep * 8


def _fused_call(x, w_p, b_p, *, gh, gw, ph, pw, compute_dtype, out_dtype):
    B, C, Hc, Wc = x.shape
    K, Ep = w_p.shape
    n_patches = gh * gw
    in_sz = jnp.dtype(x.dtype).itemsize
    csz = jnp.dtype(compute_dtype).itemsize
    osz = jnp.dtype(out_dtype).itemsize
    cost = pl.CostEstimate(
        flops=int(2 * B * n_patches * K * Ep),
        transcendentals=0,
        bytes_accessed=int(B * C * Hc * Wc * in_sz + K * Ep * csz + Ep * 4
                           + B * n_patches * Ep * osz))
    kernel = functools.partial(_fused_patch_proj_kernel, gh=gh, gw=gw,
                               ph=ph, pw=pw, compute_dtype=compute_dtype)
    return pl.pallas_call(
        kernel,
        out_shape=jax.ShapeDtypeStruct((B, n_patches, Ep), out_dtype),
        grid_spec=pltpu.PrefetchScalarGridSpec(
            num_scalar_prefetch=0,
            grid=(B,),
            in_specs=[
                pl.BlockSpec((1, C, Hc, Wc), lambda b: (b, 0, 0, 0)),  # image
                pl.BlockSpec((K, Ep), lambda b: (0, 0)),     # resident weight
                pl.BlockSpec((1, Ep), lambda b: (0, 0)),     # resident bias
            ],
            out_specs=pl.BlockSpec((1, n_patches, Ep), lambda b: (b, 0, 0)),
        ),
        compiler_params=pltpu.CompilerParams(
            # One image per step; "parallel" lets Mosaic shard steps across
            # v7x's two TensorCores (neutral on single-TC v5e/v6e).
            dimension_semantics=("parallel",),
            vmem_limit_bytes=_VMEM_LIMIT_BYTES,
        ),
        cost_estimate=cost,
    )(x, w_p, b_p)


@functools.lru_cache(maxsize=None)
def _fused_gather_supported(C, gh, gw, ph, pw, Ep,
                            in_dtype_name, compute_dtype_name, out_dtype_name):
    """One-time compile probe: does Mosaic lower the in-kernel reshuffle?"""
    try:
        in_dtype = jnp.dtype(in_dtype_name)
        compute_dtype = jnp.dtype(compute_dtype_name)
        out_dtype = jnp.dtype(out_dtype_name)
        K = C * ph * pw
        x = jnp.zeros((1, C, gh * ph, gw * pw), in_dtype)
        w = jnp.zeros((K, Ep), compute_dtype)
        b = jnp.zeros((1, Ep), jnp.float32)
        out = _fused_call(x, w, b, gh=gh, gw=gw, ph=ph, pw=pw,
                          compute_dtype=compute_dtype, out_dtype=out_dtype)
        jax.block_until_ready(out)
        return True
    except Exception:
        return False


# ---------------------------------------------------------------------------
# Public forward
# ---------------------------------------------------------------------------
def patch_embed_forward(x, weight, bias, img_size, patch_size, *,
                        compute_dtype=jnp.bfloat16, out_dtype=None,
                        tm_target=1024, fuse_patch_gather=None):
    """PatchEmbed.forward.

    x:      (B, C, H, W)   NCHW, like PyTorch
    weight: (E, C, ph, pw) Conv2d weight
    bias:   (E,)           Conv2d bias
    compute_dtype: matmul operand dtype (bfloat16 default; float32 for exact
                   PyTorch-parity testing).  Accumulation is always f32.
    out_dtype: output dtype (default x.dtype; pass bfloat16 to halve stores).
    fuse_patch_gather: True / False / None(=auto-probe; probe runs eagerly, so
                       pass an explicit bool when calling under jax.jit).
    returns (B, num_patches, E)
    """
    B, C, H, W = x.shape
    ph, pw = patch_size
    assert H == img_size[0] and W == img_size[1], (
        f"Input image size ({H}*{W}) doesn't match model "
        f"({img_size[0]}*{img_size[1]})."
    )
    gh = (H - ph) // ph + 1
    gw = (W - pw) // pw + 1
    num_patches = gh * gw
    E = weight.shape[0]
    K = C * ph * pw
    M = B * num_patches
    out_dtype = x.dtype if out_dtype is None else jnp.dtype(out_dtype)

    # VALID-conv semantics: crop trailing rows/cols that don't fill a patch.
    Hc, Wc = gh * ph, gw * pw
    if (Hc, Wc) != (H, W):
        x = x[:, :, :Hc, :Wc]

    # Weight (E, C, ph, pw) -> (K, Ep), K columns ordered (c, i, j) to match
    # the patch flattening.  Ep is 128-padded for lane-dense output stores
    # (no-op for standard ViT E); K stays unpadded here.
    Ep = _round_up(E, 128)
    w2d = weight.reshape(E, K).T.astype(compute_dtype)
    if Ep != E:
        w2d = jnp.pad(w2d, ((0, 0), (0, Ep - E)))
    b2d = bias.astype(jnp.float32).reshape(1, E)
    if Ep != E:
        b2d = jnp.pad(b2d, ((0, 0), (0, Ep - E)))

    in_sz = jnp.dtype(x.dtype).itemsize
    csz = jnp.dtype(compute_dtype).itemsize
    osz = jnp.dtype(out_dtype).itemsize

    # ---- path selection ----------------------------------------------------
    fused_fits = (_fused_vmem_bytes(C, Hc, Wc, K, Ep, num_patches,
                                    in_sz, csz, osz) <= _VMEM_WORKSET_BUDGET)
    if fuse_patch_gather is None:
        fuse = (fused_fits and not _is_tracer(x) and
                _fused_gather_supported(C, gh, gw, ph, pw, Ep,
                                        str(jnp.dtype(x.dtype)),
                                        str(jnp.dtype(compute_dtype)),
                                        str(out_dtype)))
    else:
        fuse = bool(fuse_patch_gather) and fused_fits

    if fuse:
        out = _fused_call(x, w2d, b2d, gh=gh, gw=gw, ph=ph, pw=pw,
                          compute_dtype=compute_dtype, out_dtype=out_dtype)
        return out[..., :E] if Ep != E else out

    # ---- fallback: XLA patch gather + streamed matmul kernel ----------------
    # (Used when the in-kernel reshuffle does not lower for this config or the
    # per-image tile would not fit VMEM.  Costs one extra HBM pass over x.)
    patches = x.reshape(B, C, gh, ph, gw, pw)
    patches = jnp.transpose(patches, (0, 2, 4, 1, 3, 5)).reshape(M, K)
    patches = patches.astype(compute_dtype)

    Kp = _round_up(K, 128)
    if Kp != K:                       # only pad K when it is misaligned
        patches = jnp.pad(patches, ((0, 0), (0, Kp - K)))
        w_k = jnp.pad(w2d, ((0, Kp - K), (0, 0)))
    else:
        w_k = w2d

    # M tile: as large as the VMEM budget allows (bigger DMA bursts, fewer
    # per-step epilogues).  No M padding: Pallas masks the partial last tile,
    # its garbage rows never reach HBM.
    tm = max(128, _round_up(int(tm_target), 128))

    def _workset(t):
        return (2 * t * Kp * csz + 2 * t * Ep * osz + 2 * Kp * Ep * csz
                + 2 * Ep * 4)

    while tm > 128 and _workset(tm) > _VMEM_WORKSET_BUDGET:
        tm //= 2
    if tm >= M:
        tm = M                        # single full-extent block

    cost = pl.CostEstimate(
        flops=int(2 * M * Kp * Ep),
        transcendentals=0,
        bytes_accessed=int(M * Kp * csz + Kp * Ep * csz + Ep * 4
                           + M * Ep * osz))

    out = pl.pallas_call(
        _patch_proj_kernel,
        out_shape=jax.ShapeDtypeStruct((M, Ep), out_dtype),
        grid_spec=pltpu.PrefetchScalarGridSpec(
            num_scalar_prefetch=0,
            grid=(pl.cdiv(M, tm),),
            in_specs=[
                pl.BlockSpec((tm, Kp), lambda i: (i, 0)),   # streamed patches
                pl.BlockSpec((Kp, Ep), lambda i: (0, 0)),   # resident weight
                pl.BlockSpec((1, Ep), lambda i: (0, 0)),    # resident bias
            ],
            out_specs=pl.BlockSpec((tm, Ep), lambda i: (i, 0)),
        ),
        compiler_params=pltpu.CompilerParams(
            dimension_semantics=("parallel",),   # shard M tiles across TCs
            vmem_limit_bytes=_VMEM_LIMIT_BYTES,
        ),
        cost_estimate=cost,
    )(patches, w_k, b2d)

    if Ep != E:
        out = out[:, :E]
    return out.reshape(B, num_patches, E)


# ---------------------------------------------------------------------------
# Reference + smoke test
# ---------------------------------------------------------------------------
def reference_patch_embed(x, weight, bias, patch_size,
                          compute_dtype=jnp.bfloat16):
    """Pure-JAX reference: conv (stride=kernel=patch), same bf16-in/f32-acc."""
    out = jax.lax.conv_general_dilated(
        x.astype(compute_dtype),
        weight.astype(compute_dtype),
        window_strides=patch_size,
        padding="VALID",
        dimension_numbers=("NCHW", "OIHW", "NCHW"),
        preferred_element_type=jnp.float32,
    )
    out = out + bias.astype(jnp.float32)[None, :, None, None]
    B, E, gh, gw = out.shape
    return out.reshape(B, E, gh * gw).transpose(0, 2, 1).astype(x.dtype)


if __name__ == "__main__":
    # Small shapes consistent with the module: img_size=16, patch_size=8,
    # in_chans=4, embed_dim=32  ->  grid=2, num_patches=4.
    B, C, H, W = 2, 4, 16, 16
    patch = (8, 8)
    img = (H, W)
    E = 32

    key = jax.random.PRNGKey(0)
    kx, kw, kb = jax.random.split(key, 3)

    x = jax.random.normal(kx, (B, C, H, W), dtype=jnp.float32)

    # Deterministic Conv2d-style init (kaiming-uniform-ish bounds).
    fan_in = C * patch[0] * patch[1]
    wbound = math.sqrt(1.0 / fan_in)
    weight = jax.random.uniform(
        kw, (E, C, patch[0], patch[1]), minval=-wbound, maxval=wbound,
        dtype=jnp.float32,
    )
    bias = jax.random.uniform(
        kb, (E,), minval=-wbound, maxval=wbound, dtype=jnp.float32
    )

    # Auto mode: probes whether the fused in-kernel patch gather lowers on
    # this Mosaic build and otherwise falls back to the streamed-matmul path.
    out = patch_embed_forward(x, weight, bias, img, patch)
    out = jax.block_until_ready(out)

    ref = reference_patch_embed(x, weight, bias, patch)
    np.testing.assert_allclose(np.asarray(out), np.asarray(ref),
                               rtol=2e-3, atol=2e-3)

    assert out.shape == (B, 4, E)
    print("KERNEL_OK")
</pallas_src>

<mosaic_0001>
module attributes {stable_mosaic.version = 11 : i64} {
  func.func @_fused_patch_proj_kernel(%arg0: i32, %arg1: memref<1x4x16x16xf32, #tpu.memory_space<vmem>>, %arg2: memref<256x128xbf16, #tpu.memory_space<vmem>>, %arg3: memref<1x128xf32, #tpu.memory_space<vmem>>, %arg4: memref<1x4x128xf32, #tpu.memory_space<vmem>>) attributes {dimension_semantics = [#tpu.dimension_semantics<parallel>], iteration_bounds = array<i64: 1>, scalar_prefetch = 0 : i64, scratch_operands = 0 : i64, tpu.core_type = #tpu.core_type<tc>, window_params = [{transform_indices = @transform_0, window_bounds = array<i64: 1, 4, 16, 16>}, {pipeline_mode = #tpu.pipeline_mode<synchronous>, transform_indices = @transform_1, window_bounds = array<i64: 256, 128>}, {pipeline_mode = #tpu.pipeline_mode<synchronous>, transform_indices = @transform_2, window_bounds = array<i64: 1, 128>}, {transform_indices = @transform_3, window_bounds = array<i64: 1, 4, 128>}]} {
    %c0 = arith.constant 0 : index
    %c0_0 = arith.constant 0 : index
    %c0_1 = arith.constant 0 : index
    %c0_2 = arith.constant 0 : index
    %0 = vector.load %arg1[%c0, %c0_0, %c0_1, %c0_2] : memref<1x4x16x16xf32, #tpu.memory_space<vmem>>, vector<1x4x16x16xf32>
    %1 = vector.shape_cast %0 : vector<1x4x16x16xf32> to vector<4x16x16xf32>
    %2 = vector.shape_cast %1 : vector<4x16x16xf32> to vector<4x2x8x2x8xf32>
    %3 = tpu.transpose %2, [1, 3, 0, 2, 4] : vector<4x2x8x2x8xf32> -> vector<2x2x4x8x8xf32>
    %4 = vector.shape_cast %3 : vector<2x2x4x8x8xf32> to vector<4x256xf32>
    %5 = arith.truncf %4 : vector<4x256xf32> to vector<4x256xbf16>
    %c0_3 = arith.constant 0 : index
    %c0_4 = arith.constant 0 : index
    %6 = vector.load %arg2[%c0_3, %c0_4] : memref<256x128xbf16, #tpu.memory_space<vmem>>, vector<256x128xbf16>
    %cst = arith.constant dense<0.000000e+00> : vector<4x128xf32>
    %7 = tpu.matmul %5, %6, %cst {dimension_numbers = #tpu.dot_dimension_numbers<[1], [0], [0], [1], [0, 0, 1, 1], [], []>} : vector<4x256xbf16>, vector<256x128xbf16>, vector<4x128xf32> -> vector<4x128xf32>
    %c0_5 = arith.constant 0 : index
    %c0_6 = arith.constant 0 : index
    %8 = vector.load %arg3[%c0_5, %c0_6] : memref<1x128xf32, #tpu.memory_space<vmem>>, vector<1x128xf32>
    %9 = vector.broadcast %8 : vector<1x128xf32> to vector<4x128xf32>
    %10 = arith.addf %7, %9 : vector<4x128xf32>
    %c0_7 = arith.constant 0 : index
    %c0_8 = arith.constant 0 : index
    %c0_9 = arith.constant 0 : index
    %11 = vector.load %arg4[%c0_7, %c0_8, %c0_9] : memref<1x4x128xf32, #tpu.memory_space<vmem>>, vector<1x4x128xf32>
    %12 = vector.shape_cast %11 : vector<1x4x128xf32> to vector<4x128xf32>
    %13 = vector.shape_cast %10 : vector<4x128xf32> to vector<1x4x128xf32>
    tpu.vector_store %arg4[%c0_7, %c0_8, %c0_9], %13 {strides = array<i32>} : memref<1x4x128xf32, #tpu.memory_space<vmem>>, vector<1x4x128xf32>,
    return
  }
  func.func @transform_0(%arg0: i32) -> (i32, i32, i32, i32) {
    %c0_i32 = arith.constant 0 : i32
    %c0_i32_0 = arith.constant 0 : i32
    %c0_i32_1 = arith.constant 0 : i32
    %c0_i32_2 = arith.constant 0 : i32
    return %arg0, %c0_i32, %c0_i32_0, %c0_i32_1 : i32, i32, i32, i32
  }
  func.func @transform_1(%arg0: i32) -> (i32, i32) {
    %c0_i32 = arith.constant 0 : i32
    %c0_i32_0 = arith.constant 0 : i32
    %c0_i32_1 = arith.constant 0 : i32
    return %c0_i32, %c0_i32_0 : i32, i32
  }
  func.func @transform_2(%arg0: i32) -> (i32, i32) {
    %c0_i32 = arith.constant 0 : i32
    %c0_i32_0 = arith.constant 0 : i32
    %c0_i32_1 = arith.constant 0 : i32
    return %c0_i32, %c0_i32_0 : i32, i32
  }
  func.func @transform_3(%arg0: i32) -> (i32, i32, i32) {
    %c0_i32 = arith.constant 0 : i32
    %c0_i32_0 = arith.constant 0 : i32
    %c0_i32_1 = arith.constant 0 : i32
    return %arg0, %c0_i32, %c0_i32_0 : i32, i32, i32
  }
}

module attributes {stable_mosaic.version = 11 : i64} {
  func.func @_patch_proj_kernel(%arg0: i32, %arg1: memref<8x256xbf16, #tpu.memory_space<vmem>>, %arg2: memref<256x128xbf16, #tpu.memory_space<vmem>>, %arg3: memref<1x128xf32, #tpu.memory_space<vmem>>, %arg4: memref<8x128xf32, #tpu.memory_space<vmem>>) attributes {dimension_semantics = [#tpu.dimension_semantics<parallel>], iteration_bounds = array<i64: 1>, scalar_prefetch = 0 : i64, scratch_operands = 0 : i64, tpu.core_type = #tpu.core_type<tc>, window_params = [{transform_indices = @transform_0, window_bounds = array<i64: 8, 256>}, {pipeline_mode = #tpu.pipeline_mode<synchronous>, transform_indices = @transform_1, window_bounds = array<i64: 256, 128>}, {pipeline_mode = #tpu.pipeline_mode<synchronous>, transform_indices = @transform_2, window_bounds = array<i64: 1, 128>}, {transform_indices = @transform_3, window_bounds = array<i64: 8, 128>}]} {
    %c0 = arith.constant 0 : index
    %c0_0 = arith.constant 0 : index
    %0 = vector.load %arg1[%c0, %c0_0] : memref<8x256xbf16, #tpu.memory_space<vmem>>, vector<8x256xbf16>
    %c0_1 = arith.constant 0 : index
    %c0_2 = arith.constant 0 : index
    %1 = vector.load %arg2[%c0_1, %c0_2] : memref<256x128xbf16, #tpu.memory_space<vmem>>, vector<256x128xbf16>
    %cst = arith.constant dense<0.000000e+00> : vector<8x128xf32>
    %2 = tpu.matmul %0, %1, %cst {dimension_numbers = #tpu.dot_dimension_numbers<[1], [0], [0], [1], [0, 0, 1, 1], [], []>} : vector<8x256xbf16>, vector<256x128xbf16>, vector<8x128xf32> -> vector<8x128xf32>
    %c0_3 = arith.constant 0 : index
    %c0_4 = arith.constant 0 : index
    %3 = vector.load %arg3[%c0_3, %c0_4] : memref<1x128xf32, #tpu.memory_space<vmem>>, vector<1x128xf32>
    %4 = vector.broadcast %3 : vector<1x128xf32> to vector<8x128xf32>
    %5 = arith.addf %2, %4 : vector<8x128xf32>
    %c0_5 = arith.constant 0 : index
    %c0_6 = arith.constant 0 : index
    %6 = vector.load %arg4[%c0_5, %c0_6] : memref<8x128xf32, #tpu.memory_space<vmem>>, vector<8x128xf32>
    tpu.vector_store %arg4[%c0_5, %c0_6], %5 {strides = array<i32>} : memref<8x128xf32, #tpu.memory_space<vmem>>, vector<8x128xf32>,
    return
  }
  func.func @transform_0(%arg0: i32) -> (i32, i32) {
    %c0_i32 = arith.constant 0 : i32
    %c0_i32_0 = arith.constant 0 : i32
    return %arg0, %c0_i32 : i32, i32
  }
  func.func @transform_1(%arg0: i32) -> (i32, i32) {
    %c0_i32 = arith.constant 0 : i32
    %c0_i32_0 = arith.constant 0 : i32
    %c0_i32_1 = arith.constant 0 : i32
    return %c0_i32, %c0_i32_0 : i32, i32
  }
  func.func @transform_2(%arg0: i32) -> (i32, i32) {
    %c0_i32 = arith.constant 0 : i32
    %c0_i32_0 = arith.constant 0 : i32
    %c0_i32_1 = arith.constant 0 : i32
    return %c0_i32, %c0_i32_0 : i32, i32
  }
  func.func @transform_3(%arg0: i32) -> (i32, i32) {
    %c0_i32 = arith.constant 0 : i32
    %c0_i32_0 = arith.constant 0 : i32
    return %arg0, %c0_i32 : i32, i32
  }
}

</mosaic_0001>

<bundles_post_ra>
// kernel: tpu_custom_call.1
= control target key start
LH: loop header
LB: loop body
LE: loop exit
PB: predicated region body
PF: predicated region fallthrough
CT: control target
= control target key end

     0   :  { %8 = vsyncpa [#allocation3], 0  ;;  %s449_s0 = inlined_call_operand.hbm [shape: bf16[8,256], index: 0, kind: input, shape index: {}]   ;;  %s450_s1 = inlined_call_operand.hbm [shape: bf16[256,128], index: 1, kind: input, shape index: {}]   ;;  %s451_s2 = inlined_call_operand.vmem [shape: f32[1,128], index: 2, kind: input, shape index: {}]   ;;  %s452_s3 = inlined_call_operand.hbm [shape: f32[8,128], index: 3, kind: output, shape index: {}]  }
   0x1   :  { %9 = vsyncpa [#allocation6], 0 }
   0x2   :  { %10 = vsyncpa [#allocation4], 0  ;;  %s378_s12 = smov [#allocation2]   ;;  %s379_s14 = smov [#allocation5]  }
   0x3   :  { %s17_s13 = sshll.u32 %s378_s12, 4  ;;  %s26_s15 = sshll.u32 %s379_s14, 4  ;;  %s18_s13 = int_to_ptr.vmem [resolvable:$true] %s17_s13  ;;  %s403_s15 = int_to_ptr.vmem [resolvable:$true] %s26_s15 }
   0x4   :  { %s306_s18 = scalar_lea.hbm %s449_s0, 128 }
   0x5   :  { %p307_p0 = scmp.ne.s32.totalorder %s449_s0, %s306_s18  ;;  %p310_p1 = scmp.lt.u32.totalorder %s306_s18, %s449_s0 }
   0x7   :  { %p312_p2 = pnand %p310_p1, %p307_p0 }
   0x9   :  { %315 = shalt.err (!%p312_p2)
}
   0xa   :  { %s316_s23 = scalar_lea.vmem %s18_s13, 128  ;;  %p321_p4 = scmp.lt.s32.totalorder %s18_s13, %s18_s13 }
   0xb   :  { %p317_p3 = scmp.ne.s32.totalorder %s18_s13, %s316_s23  ;;  %p322_p5 = scmp.lt.s32.totalorder %s316_s23, %s316_s23 }
   0xd   :  { %p323_p6 = por %p322_p5, %p321_p4 }
   0xf   :  { %p324_p7 = pnand %p323_p6, %p317_p3 }
  0x11   :  { %327 = shalt.err (!%p324_p7)
}
  0x12   :  { %20 = dma.hbm_to_vmem [thread:$0]  %s449_s0, 128, %s18_s13, [#allocation3]  }
  0x13   :  { %s328_s28 = scalar_lea.hbm %s450_s1, 2048 }
  0x14   :  { %p329_p8 = scmp.ne.s32.totalorder %s450_s1, %s328_s28  ;;  %p332_p9 = scmp.lt.u32.totalorder %s328_s28, %s450_s1 }
  0x16   :  { %p334_p10 = pnand %p332_p9, %p329_p8 }
  0x18   :  { %337 = shalt.err (!%p334_p10)
}
  0x19   :  { %s338_s6 = scalar_lea.vmem %s403_s15, 2048  ;;  %p343_p12 = scmp.lt.s32.totalorder %s403_s15, %s403_s15 }
  0x1a   :  { %p339_p11 = scmp.ne.s32.totalorder %s403_s15, %s338_s6  ;;  %p344_p13 = scmp.lt.s32.totalorder %s338_s6, %s338_s6 }
  0x1c   :  { %p345_p0 = por %p344_p13, %p343_p12 }
  0x1e   :  { %p346_p1 = pnand %p345_p0, %p339_p11 }
  0x20   :  { %349 = shalt.err (!%p346_p1)
}
  0x21   :  { %s380_s0 = smov 64   ;;  %s381_s7 = smov 4  }
  0x22   :  { %32 = dma.hbm_to_vmem [thread:$0]  %s450_s1, 2048, %s403_s15, [#allocation6], %s380_s0, %s380_s0, %s381_s7  }
  0x23   :  { %372 = dma.done.wait [#allocation3], 128  }
  0x24   :  { %373 = vsyncadd [#allocation3], 4294967168 }
  0x25   :  { %374 = dma.done.wait [#allocation6], 2048  }
  0x26   :  { %375 = vsyncadd [#allocation6], 4294965248  ;;  %v288_v0 = vld [vmem:[#allocation5 + $0x40] sm:$0xff]   ;;  %v290_v2 = vld [vmem:[#allocation5 + $0x48] sm:$0xff]   ;;  %s382_s11 = smov [#allocation7]  }
  0x27   :  { %v289_v1 = vld [vmem:[#allocation5] sm:$0xff]   ;;  %261 = vmatprep.subr.bf16.mxu0 %v288_v0  ;;  %v291_v3 = vld [vmem:[#allocation5 + $0x8] sm:$0xff]   ;;  %v292_v4 = vld [vmem:[#allocation5 + $0x50] sm:$0xff]   ;;  %s232_s12 = sshll.u32 %s382_s11, 4  ;;  %s233_s12 = int_to_ptr.vmem [resolvable:$true] %s232_s12 }
  0x28   :  { %262 = vmatpush3.bf16.msra.mxu0 %v289_v1  ;;  %v293_v5 = vld [vmem:[#allocation5 + $0x10] sm:$0xff]   ;;  %v294_v6 = vld [vmem:[#allocation5 + $0x58] sm:$0xff]   ;;  %v296_v8 = vld [vmem:[#allocation5 + $0x60] sm:$0xff]   ;;  %s350_s13 = scalar_lea.vmem %s233_s12, 128  ;;  %p355_p3 = scmp.lt.s32.totalorder %s233_s12, %s233_s12 }
  0x29   :  { %263 = vmatprep.subr.bf16.mxu0 %v290_v2  ;;  %v295_v7 = vld [vmem:[#allocation5 + $0x18] sm:$0xff]   ;;  %v297_v9 = vld [vmem:[#allocation5 + $0x20] sm:$0xff]   ;;  %v298_v10 = vld [vmem:[#allocation5 + $0x68] sm:$0xff]   ;;  %p351_p2 = scmp.ne.s32.totalorder %s233_s12, %s350_s13  ;;  %p356_p4 = scmp.lt.s32.totalorder %s350_s13, %s350_s13 }
  0x2a   :  { %v42_v11 = vld [vmem:[#allocation2] sm:$0xff]  ;;  %v299_v13 = vld [vmem:[#allocation5 + $0x28] sm:$0xff]   ;;  %v300_v14 = vld [vmem:[#allocation5 + $0x70] sm:$0xff]  }
  0x2b   :  { %v244_v12 = vcombine.high %v42_v11, %v42_v11  ;;  %v301_v15 = vld [vmem:[#allocation5 + $0x30] sm:$0xff]   ;;  %v302_v16 = vld [vmem:[#allocation5 + $0x78] sm:$0xff]   ;;  %v243_v18 = vcombine.low %v42_v11, %v42_v11  ;;  %p357_p5 = por %p356_p4, %p355_p3 }
  0x2c   :  { %264 = vmatpush3.bf16.msra.mxu0 %v291_v3  ;;  %v303_v17 = vld [vmem:[#allocation5 + $0x38] sm:$0xff]  }
  0x2d   :  { %265 = vmatprep.subr.bf16.mxu0 %v292_v4  ;;  %217 = vmatprep.mubr.bf16.mxu0 %v244_v12  ;;  %v242_v20 = vld [vmem:[%s451_s2] ss:$0 sm:$0xff]  ;;  %p358_p6 = pnand %p357_p5, %p351_p2 }
  0x30   :  { %266 = vmatpush3.bf16.msra.mxu0 %v293_v5 }
  0x31   :  { %267 = vmatprep.subr.bf16.mxu0 %v294_v6 }
  0x34   :  { %268 = vmatpush3.bf16.msra.mxu0 %v295_v7 }
  0x35   :  { %269 = vmatprep.subr.bf16.mxu0 %v296_v8 }
  0x38   :  { %270 = vmatpush3.bf16.msra.mxu0 %v297_v9 }
  0x39   :  { %271 = vmatprep.subr.bf16.mxu0 %v298_v10 }
  0x3c   :  { %272 = vmatpush3.bf16.msra.mxu0 %v299_v13 }
  0x3d   :  { %273 = vmatprep.subr.bf16.mxu0 %v300_v14 }
  0x40   :  { %274 = vmatpush3.bf16.msra.mxu0 %v301_v15 }
  0x41   :  { %275 = vmatprep.subr.bf16.mxu0 %v302_v16 }
  0x44   :  { %276 = vmatpush3.bf16.msra.mxu0 %v303_v17 }
  0x47   :  { %218 = vmatmul.mubr.bf16.vlgmr.msra.gmra.mrb[0].mxu0 %v243_v18 }
 0x11a   :  { %v277_v19 = vpop.f32.mrb[0].mxu0 }
 0x11b   :  { %v278_v21 = vpop.f32.mrb[1].mxu0 }
 0x11c   :  { %v279_v22 = vadd.f32 %v278_v21, %v277_v19  ;;  %v280_v23 = vpop.f32.mrb[2].mxu0 }
 0x11d   :  { %v281_v24 = vpop.f32.mrb[3].mxu0 }
 0x11e   :  { %v220_v25 = vadd.f32 %v279_v22, %v242_v20 }
 0x120   :  { %225 = vst [vmem:[#allocation7] sm:$0xff] %v220_v25 }
 0x121   :  { %361 = shalt.err (!%p358_p6)
}
 0x122   :  { %s362_s2 = scalar_lea.hbm %s452_s3, 128 }
 0x123   :  { %p363_p7 = scmp.ne.s32.totalorder %s452_s3, %s362_s2  ;;  %p366_p8 = scmp.lt.u32.totalorder %s362_s2, %s452_s3 }
 0x125   :  { %p368_p9 = pnand %p366_p8, %p363_p7 }
 0x127   :  { %371 = shalt.err (!%p368_p9)
}
 0x128   :  { %235 = dma.vmem_to_hbm [thread:$0]  %s233_s12, 128, %s452_s3, [#allocation4]  }
 0x129   :  { %376 = dma.done.wait [#allocation4], 128  }
 0x12a   :  { %377 = vsyncadd [#allocation4], 4294967168 }
 0x12b   :  { %239 = vsyncpa [#allocation3], 1 }
 0x12c   :  { %240 = vsyncpa [#allocation6], 1 }
 0x12d   :  { %241 = vsyncpa [#allocation4], 1 }

</bundles_post_ra>
